<compile_context>
chip_gen: v5e
topology: v5e:2x2
jax: 0.10.0
libtpu: 0.0.40
codegen_flags: <defaults>
</compile_context>

<pallas_src>
import jax
import jax.numpy as jnp
import numpy as np
from jax.experimental import pallas as pl
from jax.experimental.pallas import tpu as pltpu

K = 3        # kernel_size
PAD = 1      # padding
DIL = 1      # dilation
STRIDE = 1   # stride

LANE = 128
VMEM_LIMIT = 48 * 1024 * 1024   # headroom below v7x's 64 MiB physical VMEM


# ----------------------------- Pallas kernels ------------------------------ #

def _matmul_bias_kernel(cols_ref, w_ref, b_ref, o_ref):
    # offset_conv hot path: im2col-matmul + bias (regular 3x3 Conv2d), lane-dense output
    o_ref[...] = jnp.dot(cols_ref[...], w_ref[...],
                         preferred_element_type=jnp.float32) + b_ref[...]


def _deform_matmul_kernel(v00, v01, v10, v11, w00, w01, w10, w11,
                          rep_ref, wt_ref, o_ref):
    # deformable-conv hot path:
    #  - compact (tm, KK) bilinear weights broadcast to (tm, C*KK) with a tiny 0/1
    #    replication matmul (MXU is idle-ish here and this lowers unconditionally),
    #  - bilinear combine in f32 on the VPU (v5e has no bf16 VPU),
    #  - bf16 x bf16 MXU matmul with f32 accumulation.
    rep = rep_ref[...]                                     # (KK, C*KK) f32, 0/1

    def contrib(w_ref, v_ref):
        wb = jnp.dot(w_ref[...], rep, preferred_element_type=jnp.float32)  # (tm, C*KK)
        return wb * v_ref[...].astype(jnp.float32)

    cols = (contrib(w00, v00) + contrib(w01, v01)
            + contrib(w10, v10) + contrib(w11, v11))
    o_ref[...] = jnp.dot(cols.astype(jnp.bfloat16), wt_ref[...],
                         preferred_element_type=jnp.float32)


def pallas_matmul_bias(cols, wT, b, tm):
    M, D = cols.shape
    Nout = wT.shape[1]
    assert M % tm == 0
    return pl.pallas_call(
        _matmul_bias_kernel,
        out_shape=jax.ShapeDtypeStruct((M, Nout), jnp.float32),
        grid=(M // tm,),
        in_specs=[pl.BlockSpec((tm, D), lambda i: (i, 0)),
                  pl.BlockSpec((D, Nout), lambda i: (0, 0)),
                  pl.BlockSpec((1, Nout), lambda i: (0, 0))],
        out_specs=pl.BlockSpec((tm, Nout), lambda i: (i, 0)),
        compiler_params=pltpu.CompilerParams(
            dimension_semantics=("parallel",),
            vmem_limit_bytes=VMEM_LIMIT),
    )(cols, wT, b)


def pallas_deform_matmul(vals, wts, rep, wT, tm):
    M, D = vals[0].shape
    KK = wts[0].shape[1]
    Cout_p = wT.shape[1]
    assert M % tm == 0
    val_spec = pl.BlockSpec((tm, D), lambda i: (i, 0))      # bf16 corner values
    wt_spec = pl.BlockSpec((tm, KK), lambda i: (i, 0))      # compact f32 bilinear weights
    return pl.pallas_call(
        _deform_matmul_kernel,
        out_shape=jax.ShapeDtypeStruct((M, Cout_p), jnp.float32),
        grid=(M // tm,),
        in_specs=[val_spec] * 4 + [wt_spec] * 4 +
                 [pl.BlockSpec((KK, D), lambda i: (0, 0)),
                  pl.BlockSpec((D, Cout_p), lambda i: (0, 0))],
        out_specs=pl.BlockSpec((tm, Cout_p), lambda i: (i, 0)),
        compiler_params=pltpu.CompilerParams(
            dimension_semantics=("parallel",),
            vmem_limit_bytes=VMEM_LIMIT),
    )(*vals, *wts, rep, wT)


# --------------------------------- glue ------------------------------------ #

def _im2col(x):
    """Regular 3x3/s1/p1 im2col, column order (c, kh, kw)."""
    N, C, H, W = x.shape
    xp = jnp.pad(x, ((0, 0), (0, 0), (PAD, PAD), (PAD, PAD)))
    patches = [xp[:, :, i:i + H, j:j + W] for i in range(K) for j in range(K)]
    p = jnp.stack(patches, axis=0)                 # (KK, N, C, H, W)
    p = p.transpose(1, 3, 4, 2, 0)                 # (N, H, W, C, KK)
    return p.reshape(N * H * W, C * K * K)


def _pad_lanes(a, lanes):
    cur = a.shape[1]
    if cur == lanes:
        return a
    return jnp.pad(a, ((0, 0), (0, lanes - cur)))


def deform_conv_with_off(x, w_off, b_off, w_dcn, *, tm=256, return_debug=False):
    """Forward pass of DeformConvWithOff.  x: (N, Cin, H, W) f32 -> (N, Cout, H, W) f32."""
    N, C, H, W = x.shape
    KK = K * K
    M = N * H * W
    D = C * KK
    Cout = w_dcn.shape[0]
    Noff = w_off.shape[0]                      # 2 * KK

    # ---- row tiling: pad M so the 1-D grid has an EVEN number of tm-row tiles ----
    grid = max(pl.cdiv(M, tm), 1)
    grid = grid + (grid % 2)                   # even grid -> both v7x TensorCores busy
    M_pad = grid * tm

    def pad_rows(a):
        return jnp.pad(a, ((0, M_pad - M), (0, 0))) if M_pad != M else a

    # ---- offset_conv: regular Conv2d via im2col + Pallas matmul+bias (f32) ----
    Noff_p = max(LANE, ((Noff + LANE - 1) // LANE) * LANE)   # lane-dense output
    cols = _im2col(x)                                        # (M, D) f32
    off_wT = _pad_lanes(w_off.reshape(Noff, D).T, Noff_p)    # (D, Noff_p)
    off_b = _pad_lanes(b_off.reshape(1, Noff), Noff_p)       # (1, Noff_p)
    offsets_flat = pallas_matmul_bias(pad_rows(cols), off_wT, off_b, tm)[:M, :Noff]

    # channel layout (mmcv DeformConv2d v1): col 2*kk = dy, col 2*kk+1 = dx
    off = offsets_flat.reshape(N, H, W, KK, 2)
    off_h, off_w = off[..., 0], off[..., 1]                  # (N, H, W, KK)

    # ---- deformable sampling positions (all in N,H,W,KK layout; no NCHW round-trip) ----
    ki = jnp.repeat(jnp.arange(K), K).astype(jnp.float32)    # kh per kk
    kj = jnp.tile(jnp.arange(K), K).astype(jnp.float32)      # kw per kk
    base_h = (jnp.arange(H, dtype=jnp.float32)[:, None] * STRIDE
              - PAD + DIL * ki[None, :])                     # (H, KK)
    base_w = (jnp.arange(W, dtype=jnp.float32)[:, None] * STRIDE
              - PAD + DIL * kj[None, :])                     # (W, KK)
    ph = base_h[None, :, None, :] + off_h                    # (N, H, W, KK)
    pw = base_w[None, None, :, :] + off_w

    h0 = jnp.floor(ph); w0 = jnp.floor(pw)
    h1 = h0 + 1.0;      w1 = w0 + 1.0
    lh = ph - h0; lw = pw - w0
    hh = 1.0 - lh; hw = 1.0 - lw

    sample_ok = ((ph > -1) & (pw > -1) & (ph < H) & (pw < W)).astype(jnp.float32)
    vh0 = (h0 >= 0).astype(jnp.float32)
    vh1 = (h1 <= H - 1).astype(jnp.float32)
    vw0 = (w0 >= 0).astype(jnp.float32)
    vw1 = (w1 <= W - 1).astype(jnp.float32)

    # compact (M, KK) bilinear weights -- broadcast over C happens inside the kernel
    wt00 = (hh * hw * vh0 * vw0 * sample_ok).reshape(M, KK)
    wt01 = (hh * lw * vh0 * vw1 * sample_ok).reshape(M, KK)
    wt10 = (lh * hw * vh1 * vw0 * sample_ok).reshape(M, KK)
    wt11 = (lh * lw * vh1 * vw1 * sample_ok).reshape(M, KK)
    wts = (wt00, wt01, wt10, wt11)

    h0i = jnp.clip(h0, 0, H - 1).astype(jnp.int32)
    h1i = jnp.clip(h1, 0, H - 1).astype(jnp.int32)
    w0i = jnp.clip(w0, 0, W - 1).astype(jnp.int32)
    w1i = jnp.clip(w1, 0, W - 1).astype(jnp.int32)

    x_flat = x.reshape(N, C, H * W)

    # TODO(synk): the data-dependent bilinear corner gather stays in plain JAX/XLA;
    # fusing it into the Pallas kernel (VMEM-resident x slab + in-kernel dynamic
    # indexing / prefetched corner indices) is the next, largest HBM-traffic win.
    def gather(hi, wi, out_dtype):
        idx = (hi * W + wi).reshape(N, 1, H * W * KK)
        g = jnp.take_along_axis(x_flat, idx, axis=2)             # (N, C, H*W*KK)
        g = g.reshape(N, C, H, W, KK).transpose(0, 2, 3, 1, 4)   # (N, H, W, C, KK)
        return g.reshape(M, D).astype(out_dtype)

    # corner-value streams in bf16 (halves HBM DMA bytes of the dominant streams)
    vals = (gather(h0i, w0i, jnp.bfloat16), gather(h0i, w1i, jnp.bfloat16),
            gather(h1i, w0i, jnp.bfloat16), gather(h1i, w1i, jnp.bfloat16))

    # 0/1 replication matrix: rep[kk, c*KK + kk] = 1  (c-major column order)
    rep = (jnp.arange(D, dtype=jnp.int32)[None, :] % KK
           == jnp.arange(KK, dtype=jnp.int32)[:, None]).astype(jnp.float32)   # (KK, D)

    # DCN weight: bf16, Cout padded to a lane-dense multiple of 128
    Cout_p = max(LANE, ((Cout + LANE - 1) // LANE) * LANE)
    dcn_wT = _pad_lanes(w_dcn.reshape(Cout, D).T.astype(jnp.bfloat16), Cout_p)  # (D, Cout_p)

    # ---- deformable conv: weight-broadcast + bilinear combine + matmul in-kernel ----
    out_flat = pallas_deform_matmul(tuple(pad_rows(v) for v in vals),
                                    tuple(pad_rows(w) for w in wts),
                                    rep, dcn_wT, tm)[:M, :Cout]          # (M, Cout)
    # NCHW to match the PyTorch module; a fused consumer could take the NHWC slab directly.
    out = out_flat.reshape(N, H, W, Cout).transpose(0, 3, 1, 2)

    if return_debug:
        # full-f32 reference of the deformable conv on the same sampling weights
        def gather_f32(hi, wi):
            return gather(hi, wi, jnp.float32)
        corners = ((h0i, w0i), (h0i, w1i), (h1i, w0i), (h1i, w1i))
        cols_ref = sum(jnp.tile(w, (1, C)) * gather_f32(hi, wi)
                       for w, (hi, wi) in zip(wts, corners))
        out_ref = cols_ref @ w_dcn.reshape(Cout, D).T
        out_ref = out_ref.reshape(N, H, W, Cout).transpose(0, 3, 1, 2)
        return out, offsets_flat.reshape(N, H, W, Noff), out_ref
    return out


# --------------------------------- demo ------------------------------------ #

if __name__ == "__main__":
    N, Cin, Cout, H, W = 2, 4, 8, 16, 16
    KK = K * K

    key = jax.random.PRNGKey(0)
    k1, k2, k3, k4 = jax.random.split(key, 4)
    x = jax.random.normal(k1, (N, Cin, H, W), jnp.float32)
    # deterministic synthetic params (shapes from the module's __init__)
    w_off = 0.05 * jax.random.normal(k2, (2 * KK, Cin, K, K), jnp.float32)  # offset_conv.weight
    b_off = 0.05 * jax.random.normal(k3, (2 * KK,), jnp.float32)            # offset_conv.bias
    w_dcn = 0.10 * jax.random.normal(k4, (Cout, Cin, K, K), jnp.float32)    # dcn.weight (no bias)

    out, offsets_nhwc, out_ref = deform_conv_with_off(x, w_off, b_off, w_dcn,
                                                      return_debug=True)
    out = jax.block_until_ready(out)

    # sanity: offset conv (Pallas im2col matmul, f32) vs XLA conv reference
    off_xla = jax.lax.conv_general_dilated(
        x, w_off, window_strides=(1, 1), padding=((PAD, PAD), (PAD, PAD)),
        dimension_numbers=("NCHW", "OIHW", "NCHW")) + b_off[None, :, None, None]
    np.testing.assert_allclose(np.asarray(offsets_nhwc),
                               np.asarray(off_xla.transpose(0, 2, 3, 1)),
                               rtol=1e-4, atol=1e-4)

    # sanity: bf16 deformable-conv kernel vs full-f32 plain-JAX reference
    np.testing.assert_allclose(np.asarray(out), np.asarray(out_ref),
                               rtol=5e-2, atol=5e-2)

    assert out.shape == (N, Cout, H, W)
    print("KERNEL_OK")
</pallas_src>

<mosaic_0001>
module attributes {stable_mosaic.version = 11 : i64} {
  func.func @_matmul_bias_kernel(%arg0: i32, %arg1: memref<256x36xf32, #tpu.memory_space<vmem>>, %arg2: memref<36x128xf32, #tpu.memory_space<vmem>>, %arg3: memref<1x128xf32, #tpu.memory_space<vmem>>, %arg4: memref<256x128xf32, #tpu.memory_space<vmem>>) attributes {dimension_semantics = [#tpu.dimension_semantics<parallel>], iteration_bounds = array<i64: 2>, scalar_prefetch = 0 : i64, scratch_operands = 0 : i64, tpu.core_type = #tpu.core_type<tc>, window_params = [{transform_indices = @transform_0, window_bounds = array<i64: 256, 36>}, {pipeline_mode = #tpu.pipeline_mode<synchronous>, transform_indices = @transform_1, window_bounds = array<i64: 36, 128>}, {pipeline_mode = #tpu.pipeline_mode<synchronous>, transform_indices = @transform_2, window_bounds = array<i64: 1, 128>}, {transform_indices = @transform_3, window_bounds = array<i64: 256, 128>}]} {
    %c0 = arith.constant 0 : index
    %c0_0 = arith.constant 0 : index
    %0 = vector.load %arg1[%c0, %c0_0] : memref<256x36xf32, #tpu.memory_space<vmem>>, vector<256x36xf32>
    %c0_1 = arith.constant 0 : index
    %c0_2 = arith.constant 0 : index
    %1 = vector.load %arg2[%c0_1, %c0_2] : memref<36x128xf32, #tpu.memory_space<vmem>>, vector<36x128xf32>
    %cst = arith.constant dense<0.000000e+00> : vector<256x128xf32>
    %2 = tpu.matmul %0, %1, %cst {dimension_numbers = #tpu.dot_dimension_numbers<[1], [0], [0], [1], [0, 0, 1, 1], [], []>} : vector<256x36xf32>, vector<36x128xf32>, vector<256x128xf32> -> vector<256x128xf32>
    %c0_3 = arith.constant 0 : index
    %c0_4 = arith.constant 0 : index
    %3 = vector.load %arg3[%c0_3, %c0_4] : memref<1x128xf32, #tpu.memory_space<vmem>>, vector<1x128xf32>
    %4 = vector.broadcast %3 : vector<1x128xf32> to vector<256x128xf32>
    %5 = arith.addf %2, %4 : vector<256x128xf32>
    %c0_5 = arith.constant 0 : index
    %c0_6 = arith.constant 0 : index
    %6 = vector.load %arg4[%c0_5, %c0_6] : memref<256x128xf32, #tpu.memory_space<vmem>>, vector<256x128xf32>
    tpu.vector_store %arg4[%c0_5, %c0_6], %5 {strides = array<i32>} : memref<256x128xf32, #tpu.memory_space<vmem>>, vector<256x128xf32>,
    return
  }
  func.func @transform_0(%arg0: i32) -> (i32, i32) {
    %c0_i32 = arith.constant 0 : i32
    %c0_i32_0 = arith.constant 0 : i32
    return %arg0, %c0_i32 : i32, i32
  }
  func.func @transform_1(%arg0: i32) -> (i32, i32) {
    %c0_i32 = arith.constant 0 : i32
    %c0_i32_0 = arith.constant 0 : i32
    %c0_i32_1 = arith.constant 0 : i32
    return %c0_i32, %c0_i32_0 : i32, i32
  }
  func.func @transform_2(%arg0: i32) -> (i32, i32) {
    %c0_i32 = arith.constant 0 : i32
    %c0_i32_0 = arith.constant 0 : i32
    %c0_i32_1 = arith.constant 0 : i32
    return %c0_i32, %c0_i32_0 : i32, i32
  }
  func.func @transform_3(%arg0: i32) -> (i32, i32) {
    %c0_i32 = arith.constant 0 : i32
    %c0_i32_0 = arith.constant 0 : i32
    return %arg0, %c0_i32 : i32, i32
  }
}

</mosaic_0001>

<bundles_post_ra>
// kernel: tpu_custom_call.1
= control target key start
LH: loop header
LB: loop body
LE: loop exit
PB: predicated region body
PF: predicated region fallthrough
CT: control target
= control target key end

     0   :  { %8 = vsyncpa [#allocation3], 0  ;;  %s967_s0 = inlined_call_operand.vmem [shape: f32[512,36], index: 0, kind: input, shape index: {}]   ;;  %s968_s1 = inlined_call_operand.vmem [shape: f32[36,128], index: 1, kind: input, shape index: {}]   ;;  %s969_s2 = inlined_call_operand.vmem [shape: f32[1,128], index: 2, kind: input, shape index: {}]   ;;  %s970_s3 = inlined_call_operand.hbm [shape: f32[512,128], index: 3, kind: output, shape index: {}]  }
   0x1   :  { %10 = vsyncpa [#allocation3 + $0x1], 0  ;;  %s726_s12 = smov 0   ;;  %s728_s13 = smov 0  }
   0x2   :  { %s730_s14 = smov 0   ;;  %s732_s15 = smov 0  }
   0x3 LB: > { %s747_s16 = sadd.s32 4294967295, %s702_s15   ;;  %s537_s17 = sadd.s32 4294967294, %s702_s15   ;;  %s702_s15 = sphi %s732_s15, %s976_s15   ;;  %s698_s14 = sphi %s730_s14, %s975_s14   ;;  %s694_s13 = sphi %s728_s13, %s974_s13   ;;  %s690_s12 = sphi %s726_s12, %s973_s12  }
   0x4   : > { %s751_s18 = sadd.s32 1, %s702_s15   ;;  %s91_s19 = sadd.s32 1, %s698_s14 }
   0x5   : > { %s88_s20 = ssub.s32 %s702_s15, %s751_s18  ;;  %p101_p0 = scmp.ne.s32.totalorder %s698_s14, %s694_s13 }
   0x6   : > { %p89_p1 = scmp.eq.s32.totalorder %s88_s20, 0  ;;  %p102_p2 = scmp.eq.s32.totalorder %s747_s16, 1 }
   0x7   : > { %p107_p3 = scmp.ne.s32.totalorder %s694_s13, %s690_s12  ;;  %p108_p4 = scmp.eq.s32.totalorder %s537_s17, 1 }
   0x8   : > { %s762_s21 = scalar_select %p89_p1, %s698_s14, %s91_s19  }
   0x9   : > { %p764_p5 = por %p102_p2, %p101_p0  ;;  %p768_p6 = por %p108_p4, %p107_p3 }
   0xa   : > { %p540_p7 = scmp.ge.s32.totalorder %s702_s15, 1  ;;  %p141_p8 = scmp.lt.s32.totalorder %s702_s15, 3 }
   0xc   : > { %p142_p9 = pnand %p540_p7, %p141_p8 }
   0xd   : > { %s542_s28 = sshll.u32 (!%p142_p9), %s747_s16, 5  ;;  %s162_s17 = sand.u32 (!%p142_p9), 1, %s694_s13  }
   0xe   : > { %145 = sbr.rel (%p142_p9) target bundleno = 224 (0xe0), region = 32  ;;  %p166_p10 = scmp.lt.s32.totalorder (!%p142_p9), %s542_s28, 63 }
   0xf   : > { %s541_s19 = sshll.u32 (!%p142_p9), %s162_s17, 8  ;;  %s582_s26 = sshll.u32 (!%p142_p9), %s747_s16, 8 }
  0x10   : > { %s869_s25 = scalar_lea.vmem (!%p142_p9), [#allocation2], %s541_s19  ;;  %s471_s29 = scalar_lea.hbm (!%p142_p9), %s970_s3, %s582_s26 }
  0x11   : > { %s472_s16 = sshll.u32 (!%p142_p9), %s869_s25, 4  ;;  %s474_s30 = sshll.u32 (!%p142_p9), %s471_s29, 4  ;;  %s473_s16 = int_to_ptr.vmem [resolvable:$true] %s472_s16  ;;  %s475_s30 = int_to_ptr.hbm [resolvable:$true] %s474_s30 }
  0x12   : > { %s460_s4 = scalar_lea.sflag (!%p142_p9), [#allocation3], %s162_s17  ;;  %s654_s5 = sshra.s32 (!%p142_p9), %s475_s30, 4  ;;  %s655_s5 = int_to_ptr.hbm [resolvable:$true] %s654_s5 }
  0x13   : > { %v208_v0 = vld [vmem:[%s968_s1 + $0x20] sm:$0xf]  ;;  %vm310_vm0 = vcmask 1043456   ;;  %v207_v1 = vld [vmem:[%s968_s1 + $0x18] sm:$0xff]  ;;  %v206_v2 = vld [vmem:[%s968_s1 + $0x10] sm:$0xff]  ;;  %s978_s28 = smov (!%p166_p10, %s542_s28), 63  ;;  %p661_p0 = scmp.lt.s32.totalorder %s655_s5, %s970_s3 }
  0x14   : > { %584 = vmatpush.msk.msra.mxu2 %vm310_vm0, %v208_v0  ;;  %585 = vmatpush.msk.msra.mxu3 %vm310_vm0, %v208_v0  ;;  %v205_v3 = vld [vmem:[%s968_s1 + $0x8] sm:$0xff]  ;;  %s543_s6 = sshll.u32 %s978_s28, 3  ;;  %v204_v4 = vld [vmem:[%s968_s1] sm:$0xff]  ;;  %vm213_vm1 = vcmask 293888   ;;  %s660_s9 = scalar_lea.hbm %s970_s3, 512 }
  0x15   : > { %544 = vmatpush.msk.msra.mxu0 %vm310_vm0, %v208_v0  ;;  %583 = vmatpush.msk.msra.mxu1 %vm310_vm0, %v208_v0  ;;  %s793_s11 = scalar_lea.vmem %s967_s0, %s543_s6  ;;  %v865_v37 = vld [vmem:[%s969_s2] ss:$0 sm:$0xff]  ;;  %s656_s6 = scalar_lea.hbm %s655_s5, 256 }
  0x16   : > { %587 = vmatpush.msra.mxu2 %v207_v1  ;;  %588 = vmatpush.msra.mxu3 %v207_v1  ;;  %v188_v5 = vld [vmem:[%s793_s11 + $0x80] sm:$0xff]  ;;  %v189_v9 = vld [vmem:[%s793_s11 + $0x88] sm:$0xff]  ;;  %v190_v13 = vld [vmem:[%s793_s11 + $0x90] sm:$0xff]  ;;  %p657_p11 = scmp.ne.s32.totalorder %s655_s5, %s656_s6  ;;  %p662_p1 = scmp.lt.s32.totalorder %s660_s9, %s656_s6 }
  0x17   : > { %326 = vmatpush.msra.mxu0 %v207_v1  ;;  %586 = vmatpush.msra.mxu1 %v207_v1  ;;  %v196_v6 = vld [vmem:[%s793_s11 + $0xc0] sm:$0xff]  ;;  %v197_v10 = vld [vmem:[%s793_s11 + $0xc8] sm:$0xff]  ;;  %v198_v14 = vld [vmem:[%s793_s11 + $0xd0] sm:$0xff] }
  0x18   : > { %590 = vmatpush.msra.mxu2 %v206_v2  ;;  %591 = vmatpush.msra.mxu3 %v206_v2  ;;  %v172_v7 = vld [vmem:[%s793_s11] sm:$0xff]  ;;  %v173_v11 = vld [vmem:[%s793_s11 + $0x8] sm:$0xff]  ;;  %v174_v15 = vld [vmem:[%s793_s11 + $0x10] sm:$0xff]  ;;  %p658_p12 = pnand %p657_p11, %p764_p5  ;;  %p663_p2 = por %p662_p1, %p661_p0 }
  0x19   : > { %327 = vmatpush.msra.mxu0 %v206_v2  ;;  %589 = vmatpush.msra.mxu1 %v206_v2  ;;  %v180_v8 = vld [vmem:[%s793_s11 + $0x40] sm:$0xff]  ;;  %v181_v12 = vld [vmem:[%s793_s11 + $0x48] sm:$0xff]  ;;  %v182_v16 = vld [vmem:[%s793_s11 + $0x50] sm:$0xff] }
  0x1a   : > { %593 = vmatpush.msra.mxu2 %v205_v3  ;;  %594 = vmatpush.msra.mxu3 %v205_v3  ;;  %v191_v17 = vld [vmem:[%s793_s11 + $0x98] sm:$0xff]  ;;  %v192_v21 = vld [vmem:[%s793_s11 + $0xa0] sm:$0xff]  ;;  %v193_v25 = vld [vmem:[%s793_s11 + $0xa8] sm:$0xff]  ;;  %p659_p13 = pneg %p658_p12 }
  0x1b   : > { %328 = vmatpush.msra.mxu0 %v205_v3  ;;  %592 = vmatpush.msra.mxu1 %v205_v3  ;;  %v199_v18 = vld [vmem:[%s793_s11 + $0xd8] sm:$0xff]  ;;  %v200_v22 = vld [vmem:[%s793_s11 + $0xe0] sm:$0xff]  ;;  %v201_v26 = vld [vmem:[%s793_s11 + $0xe8] sm:$0xff] }
  0x1c   : > { %596 = vmatpush.msra.mxu2 %v204_v4  ;;  %597 = vmatpush.msra.mxu3 %v204_v4  ;;  %v175_v19 = vld [vmem:[%s793_s11 + $0x18] sm:$0xff]  ;;  %v176_v23 = vld [vmem:[%s793_s11 + $0x20] sm:$0xff]  ;;  %v177_v27 = vld [vmem:[%s793_s11 + $0x28] sm:$0xff]  ;;  %p664_p3 = pnand %p663_p2, %p659_p13 }
  0x1d   : > { %561 = vmatmul.msk.f32.vlgmr.msra.gmra.mxu2 %vm213_vm1, %v188_v5  ;;  %569 = vmatmul.msk.f32.vlgmr.msra.gmra.mxu3 %vm213_vm1, %v196_v6  ;;  %v183_v20 = vld [vmem:[%s793_s11 + $0x58] sm:$0xff]  ;;  %v184_v24 = vld [vmem:[%s793_s11 + $0x60] sm:$0xff]  ;;  %v185_v28 = vld [vmem:[%s793_s11 + $0x68] sm:$0xff] }
  0x1e   : > { %329 = vmatpush.msra.mxu0 %v204_v4  ;;  %595 = vmatpush.msra.mxu1 %v204_v4  ;;  %v194_v29 = vld [vmem:[%s793_s11 + $0xb0] sm:$0xff]  ;;  %v195_v33 = vld [vmem:[%s793_s11 + $0xb8] sm:$0xff] }
  0x1f   : > { %545 = vmatmul.msk.f32.vlgmr.msra.gmra.mxu0 %vm213_vm1, %v172_v7  ;;  %553 = vmatmul.msk.f32.vlgmr.msra.gmra.mxu1 %vm213_vm1, %v180_v8  ;;  %v202_v30 = vld [vmem:[%s793_s11 + $0xf0] sm:$0xff]  ;;  %v203_v34 = vld [vmem:[%s793_s11 + $0xf8] sm:$0xff] }
  0x20   : > { %v178_v31 = vld [vmem:[%s793_s11 + $0x30] sm:$0xff]  ;;  %v179_v35 = vld [vmem:[%s793_s11 + $0x38] sm:$0xff] }
  0x21   : > { %v186_v32 = vld [vmem:[%s793_s11 + $0x70] sm:$0xff]  ;;  %v187_v36 = vld [vmem:[%s793_s11 + $0x78] sm:$0xff] }
  0x25   : > { %562 = vmatmul.msk.f32.gmra.mxu2 %vm213_vm1, %v189_v9  ;;  %570 = vmatmul.msk.f32.gmra.mxu3 %vm213_vm1, %v197_v10 }
  0x27   : > { %546 = vmatmul.msk.f32.gmra.mxu0 %vm213_vm1, %v173_v11  ;;  %554 = vmatmul.msk.f32.gmra.mxu1 %vm213_vm1, %v181_v12 }
  0x2d   : > { %563 = vmatmul.msk.f32.gmra.mxu2 %vm213_vm1, %v190_v13  ;;  %571 = vmatmul.msk.f32.gmra.mxu3 %vm213_vm1, %v198_v14 }
  0x2f   : > { %547 = vmatmul.msk.f32.gmra.mxu0 %vm213_vm1, %v174_v15  ;;  %555 = vmatmul.msk.f32.gmra.mxu1 %vm213_vm1, %v182_v16 }
  0x35   : > { %564 = vmatmul.msk.f32.gmra.mxu2 %vm213_vm1, %v191_v17  ;;  %572 = vmatmul.msk.f32.gmra.mxu3 %vm213_vm1, %v199_v18 }
  0x37   : > { %548 = vmatmul.msk.f32.gmra.mxu0 %vm213_vm1, %v175_v19  ;;  %556 = vmatmul.msk.f32.gmra.mxu1 %vm213_vm1, %v183_v20 }
  0x3d   : > { %565 = vmatmul.msk.f32.gmra.mxu2 %vm213_vm1, %v192_v21  ;;  %573 = vmatmul.msk.f32.gmra.mxu3 %vm213_vm1, %v200_v22 }
  0x3f   : > { %549 = vmatmul.msk.f32.gmra.mxu0 %vm213_vm1, %v176_v23  ;;  %557 = vmatmul.msk.f32.gmra.mxu1 %vm213_vm1, %v184_v24 }
  0x45   : > { %566 = vmatmul.msk.f32.gmra.mxu2 %vm213_vm1, %v193_v25  ;;  %574 = vmatmul.msk.f32.gmra.mxu3 %vm213_vm1, %v201_v26 }
  0x47   : > { %550 = vmatmul.msk.f32.gmra.mxu0 %vm213_vm1, %v177_v27  ;;  %558 = vmatmul.msk.f32.gmra.mxu1 %vm213_vm1, %v185_v28 }
  0x4d   : > { %567 = vmatmul.msk.f32.gmra.mxu2 %vm213_vm1, %v194_v29  ;;  %575 = vmatmul.msk.f32.gmra.mxu3 %vm213_vm1, %v202_v30 }
  0x4f   : > { %551 = vmatmul.msk.f32.gmra.mxu0 %vm213_vm1, %v178_v31  ;;  %559 = vmatmul.msk.f32.gmra.mxu1 %vm213_vm1, %v186_v32 }
  0x55   : > { %568 = vmatmul.msk.f32.gmra.mxu2 %vm213_vm1, %v195_v33  ;;  %576 = vmatmul.msk.f32.gmra.mxu3 %vm213_vm1, %v203_v34 }
  0x57   : > { %552 = vmatmul.msk.f32.gmra.mxu0 %vm213_vm1, %v179_v35  ;;  %560 = vmatmul.msk.f32.gmra.mxu1 %vm213_vm1, %v187_v36 }
  0x9c   : > { %v331_v38 = vpop.f32.mrf.mxu0  ;;  %v355_v39 = vpop.f32.mrf.mxu1 }
  0x9d   : > { %v332_v40 = vadd.f32 %v865_v37, %v331_v38  ;;  %v356_v41 = vadd.f32 %v865_v37, %v355_v39 }
  0x9f   : > { %427 = vst [vmem:[%s869_s25] sm:$0xff] %v332_v40 }
  0xa0   : > { %435 = vst [vmem:[%s869_s25 + $0x40] sm:$0xff] %v356_v41  ;;  %v379_v42 = vpop.f32.mrf.mxu2  ;;  %v403_v43 = vpop.f32.mrf.mxu3 }
  0xa1   : > { %v380_v44 = vadd.f32 %v865_v37, %v379_v42  ;;  %v404_v45 = vadd.f32 %v865_v37, %v403_v43 }
  0xa3   : > { %443 = vst [vmem:[%s869_s25 + $0x80] sm:$0xff] %v380_v44 }
  0xa4   : > { %451 = vst [vmem:[%s869_s25 + $0xc0] sm:$0xff] %v404_v45  ;;  %v334_v46 = vpop.f32.mrf.mxu0  ;;  %v358_v47 = vpop.f32.mrf.mxu1 }
  0xa5   : > { %v335_v48 = vadd.f32 %v865_v37, %v334_v46  ;;  %v359_v49 = vadd.f32 %v865_v37, %v358_v47 }
  0xa7   : > { %428 = vst [vmem:[%s869_s25 + $0x8] sm:$0xff] %v335_v48 }
  0xa8   : > { %436 = vst [vmem:[%s869_s25 + $0x48] sm:$0xff] %v359_v49  ;;  %v382_v50 = vpop.f32.mrf.mxu2  ;;  %v406_v51 = vpop.f32.mrf.mxu3 }
  0xa9   : > { %v383_v52 = vadd.f32 %v865_v37, %v382_v50  ;;  %v407_v53 = vadd.f32 %v865_v37, %v406_v51 }
  0xab   : > { %444 = vst [vmem:[%s869_s25 + $0x88] sm:$0xff] %v383_v52 }
  0xac   : > { %452 = vst [vmem:[%s869_s25 + $0xc8] sm:$0xff] %v407_v53  ;;  %v337_v54 = vpop.f32.mrf.mxu0  ;;  %v361_v55 = vpop.f32.mrf.mxu1 }
  0xad   : > { %v338_v56 = vadd.f32 %v865_v37, %v337_v54  ;;  %v362_v57 = vadd.f32 %v865_v37, %v361_v55 }
  0xaf   : > { %429 = vst [vmem:[%s869_s25 + $0x10] sm:$0xff] %v338_v56 }
  0xb0   : > { %437 = vst [vmem:[%s869_s25 + $0x50] sm:$0xff] %v362_v57  ;;  %v385_v58 = vpop.f32.mrf.mxu2  ;;  %v409_v59 = vpop.f32.mrf.mxu3 }
  0xb1   : > { %v386_v60 = vadd.f32 %v865_v37, %v385_v58  ;;  %v410_v61 = vadd.f32 %v865_v37, %v409_v59 }
  0xb3   : > { %445 = vst [vmem:[%s869_s25 + $0x90] sm:$0xff] %v386_v60 }
  0xb4   : > { %453 = vst [vmem:[%s869_s25 + $0xd0] sm:$0xff] %v410_v61  ;;  %v340_v62 = vpop.f32.mrf.mxu0  ;;  %v364_v63 = vpop.f32.mrf.mxu1 }
  0xb5   : > { %v341_v0 = vadd.f32 %v865_v37, %v340_v62  ;;  %v365_v1 = vadd.f32 %v865_v37, %v364_v63 }
  0xb7   : > { %430 = vst [vmem:[%s869_s25 + $0x18] sm:$0xff] %v341_v0 }
  0xb8   : > { %438 = vst [vmem:[%s869_s25 + $0x58] sm:$0xff] %v365_v1  ;;  %v388_v2 = vpop.f32.mrf.mxu2  ;;  %v412_v3 = vpop.f32.mrf.mxu3 }
  0xb9   : > { %v389_v4 = vadd.f32 %v865_v37, %v388_v2  ;;  %v413_v5 = vadd.f32 %v865_v37, %v412_v3 }
  0xbb   : > { %446 = vst [vmem:[%s869_s25 + $0x98] sm:$0xff] %v389_v4 }
  0xbc   : > { %454 = vst [vmem:[%s869_s25 + $0xd8] sm:$0xff] %v413_v5  ;;  %v343_v6 = vpop.f32.mrf.mxu0  ;;  %v367_v7 = vpop.f32.mrf.mxu1 }
  0xbd   : > { %v344_v8 = vadd.f32 %v865_v37, %v343_v6  ;;  %v368_v9 = vadd.f32 %v865_v37, %v367_v7 }
  0xbf   : > { %431 = vst [vmem:[%s869_s25 + $0x20] sm:$0xff] %v344_v8 }
  0xc0   : > { %439 = vst [vmem:[%s869_s25 + $0x60] sm:$0xff] %v368_v9  ;;  %v391_v10 = vpop.f32.mrf.mxu2  ;;  %v415_v11 = vpop.f32.mrf.mxu3 }
  0xc1   : > { %v392_v12 = vadd.f32 %v865_v37, %v391_v10  ;;  %v416_v13 = vadd.f32 %v865_v37, %v415_v11 }
  0xc3   : > { %447 = vst [vmem:[%s869_s25 + $0xa0] sm:$0xff] %v392_v12 }
  0xc4   : > { %455 = vst [vmem:[%s869_s25 + $0xe0] sm:$0xff] %v416_v13  ;;  %v346_v14 = vpop.f32.mrf.mxu0  ;;  %v370_v15 = vpop.f32.mrf.mxu1 }
  0xc5   : > { %v347_v16 = vadd.f32 %v865_v37, %v346_v14  ;;  %v371_v17 = vadd.f32 %v865_v37, %v370_v15 }
  0xc7   : > { %432 = vst [vmem:[%s869_s25 + $0x28] sm:$0xff] %v347_v16 }
  0xc8   : > { %440 = vst [vmem:[%s869_s25 + $0x68] sm:$0xff] %v371_v17  ;;  %v394_v18 = vpop.f32.mrf.mxu2  ;;  %v418_v19 = vpop.f32.mrf.mxu3 }
  0xc9   : > { %v395_v20 = vadd.f32 %v865_v37, %v394_v18  ;;  %v419_v21 = vadd.f32 %v865_v37, %v418_v19 }
  0xcb   : > { %448 = vst [vmem:[%s869_s25 + $0xa8] sm:$0xff] %v395_v20 }
  0xcc   : > { %456 = vst [vmem:[%s869_s25 + $0xe8] sm:$0xff] %v419_v21  ;;  %v349_v22 = vpop.f32.mrf.mxu0  ;;  %v373_v23 = vpop.f32.mrf.mxu1 }
  0xcd   : > { %v350_v24 = vadd.f32 %v865_v37, %v349_v22  ;;  %v374_v25 = vadd.f32 %v865_v37, %v373_v23 }
  0xcf   : > { %433 = vst [vmem:[%s869_s25 + $0x30] sm:$0xff] %v350_v24 }
  0xd0   : > { %441 = vst [vmem:[%s869_s25 + $0x70] sm:$0xff] %v374_v25  ;;  %v397_v26 = vpop.f32.mrf.mxu2  ;;  %v421_v27 = vpop.f32.mrf.mxu3 }
  0xd1   : > { %v398_v28 = vadd.f32 %v865_v37, %v397_v26  ;;  %v422_v29 = vadd.f32 %v865_v37, %v421_v27 }
  0xd3   : > { %449 = vst [vmem:[%s869_s25 + $0xb0] sm:$0xff] %v398_v28 }
  0xd4   : > { %457 = vst [vmem:[%s869_s25 + $0xf0] sm:$0xff] %v422_v29  ;;  %v352_v30 = vpop.f32.mrf.mxu0  ;;  %v376_v31 = vpop.f32.mrf.mxu1 }
  0xd5   : > { %v353_v32 = vadd.f32 %v865_v37, %v352_v30  ;;  %v377_v33 = vadd.f32 %v865_v37, %v376_v31 }
  0xd7   : > { %434 = vst [vmem:[%s869_s25 + $0x38] sm:$0xff] %v353_v32 }
  0xd8   : > { %442 = vst [vmem:[%s869_s25 + $0x78] sm:$0xff] %v377_v33  ;;  %v400_v34 = vpop.f32.mrf.mxu2  ;;  %v424_v35 = vpop.f32.mrf.mxu3 }
  0xd9   : > { %v401_v36 = vadd.f32 %v865_v37, %v400_v34  ;;  %v425_v38 = vadd.f32 %v865_v37, %v424_v35 }
  0xdb   : > { %450 = vst [vmem:[%s869_s25 + $0xb8] sm:$0xff] %v401_v36 }
  0xdc   : > { %458 = vst [vmem:[%s869_s25 + $0xf8] sm:$0xff] %v425_v38 }
  0xdd   : > { %667 = shalt.err (!%p664_p3)
}
  0xde   : > { %s704_s17 = smov 128   ;;  %s705_s19 = smov 8  }
  0xdf   : > { %598 = dma.vmem_to_hbm [thread:$0]  (%p764_p5), %s473_s16, 4096, %s475_s30, %s460_s4, %s704_s17, %s704_s17, %s705_s19  }
  0xe0 PF: > { %p604_p4 = scmp.ge.s32.totalorder %s702_s15, 2  ;;  %s489_s20 = sand.u32 1, %s690_s12  }
  0xe1   : > { %s490_s24 = scalar_lea.sflag [#allocation3], %s489_s20 }
  0xe2   : > { %p601_p7 = pnand %p604_p4, %p768_p6 }
  0xe4   : > { %p602_p8 = pneg %p601_p7 }
  0xe6   : > { %685 = dma.done.wait (%p602_p8), %s490_s24, 4096  }
  0xe7   : > { %687 = vsyncadd (%p602_p8), %s490_s24, 4294963200  ;;  %p13_p9 = scmp.ge.s32.totalorder %s751_s18, 4   ;;  %s973_s12 = smov %s694_s13 }
  0xe8   : > { %s974_s13 = smov %s698_s14  ;;  %s975_s14 = smov %s762_s21 }
  0xe9   : > { %s976_s15 = smov %s751_s18  ;;  %15 = sbr.rel (!%p13_p9) target bundleno = 3 (0x3), region = 67 }
  0xee   :  { %496 = vsyncpa [#allocation3], 1 }
  0xef   :  { %498 = vsyncpa [#allocation3 + $0x1], 1 }

</bundles_post_ra>
